<compile_context>
chip_gen: v5e
topology: v5e:2x2
jax: 0.10.0
libtpu: 0.0.40
codegen_flags: <defaults>
</compile_context>

<pallas_src>
import functools

import numpy as np
import jax
import jax.numpy as jnp
from jax.experimental import pallas as pl
from jax.experimental.pallas import tpu as pltpu

# Default tile sizes for f32 (min legal tile is (8, 128); keep the lane dim a
# multiple of 128 so output stores are unmasked). bf16 subclasses: >= (16, 128).
_TILE_R = 128
_TILE_C = 256


def _passthrough_kernel(x_ref, o_ref):
    # Trivial per-tile body; subclass aggregators replace this with their
    # reduction (accumulate in f32 scratch, store once per output tile).
    o_ref[...] = x_ref[...]


@functools.partial(jax.jit, donate_argnums=0)
def _passthrough_pallas(x: jax.Array) -> jax.Array:
    """Tiled, aliased identity: template for subclass aggregation kernels."""
    rows, cols = x.shape
    tr = min(_TILE_R, rows)
    tc = min(_TILE_C, cols)
    grid = (pl.cdiv(rows, tr), pl.cdiv(cols, tc))
    return pl.pallas_call(
        _passthrough_kernel,
        out_shape=jax.ShapeDtypeStruct(x.shape, x.dtype),
        grid_spec=pltpu.PrefetchScalarGridSpec(
            num_scalar_prefetch=0,
            grid=grid,
            in_specs=[pl.BlockSpec((tr, tc), lambda i, j: (i, j))],
            out_specs=pl.BlockSpec((tr, tc), lambda i, j: (i, j)),
        ),
        # Output aliases the donated input: no extra HBM allocation and no
        # second round trip for the identity pass-through.
        input_output_aliases={0: 0},
        compiler_params=pltpu.CompilerParams(
            dimension_semantics=("parallel", "parallel"),
        ),
    )(x)


class BaseAggregator:
    """JAX/Pallas mirror of the PyTorch BaseAggregator.

    Matches the reference exactly: no parameters are created in __init__ and
    forward() takes no arguments and returns None.
    """

    def __init__(self):
        # Reference __init__ is `pass` (declares no weights / buffers).
        pass

    def forward(self):
        # Reference forward is `pass` -> returns None.
        return None

    def __call__(self):
        return self.forward()

    # Concrete kernel hook (not part of the reference forward; provided so the
    # Pallas path is actually compiled and executed on TPU, and so subclasses
    # inherit sane tiling / aliasing / megacore defaults).
    # NOTE: the input buffer is DONATED (aliased to the output).
    @staticmethod
    def _demo_kernel(x: jax.Array) -> jax.Array:
        return _passthrough_pallas(x)


if __name__ == "__main__":
    key = jax.random.PRNGKey(0)
    # Small but grid-tiled f32 slab: (256, 512) -> 2x2 grid of (128, 256) tiles.
    x = jax.random.normal(key, (256, 512), dtype=jnp.float32)
    # Keep a host-side reference copy; `x` is donated to the kernel below.
    x_host = np.asarray(x)

    agg = BaseAggregator()

    # Exact reference semantics: forward() returns None.
    out = agg()
    assert out is None

    # Run the Pallas kernel once and block on the result.
    y = BaseAggregator._demo_kernel(x)
    y = jax.block_until_ready(y)
    assert y.shape == x_host.shape and y.dtype == x_host.dtype
    assert np.allclose(np.asarray(y), x_host)

    print("KERNEL_OK")
</pallas_src>

<mosaic_0001>
module attributes {stable_mosaic.version = 11 : i64} {
  func.func @_passthrough_kernel(%arg0: i32, %arg1: i32, %arg2: memref<128x256xf32, #tpu.memory_space<vmem>>, %arg3: memref<128x256xf32, #tpu.memory_space<vmem>>) attributes {dimension_semantics = [#tpu.dimension_semantics<parallel>, #tpu.dimension_semantics<parallel>], iteration_bounds = array<i64: 2, 2>, scalar_prefetch = 0 : i64, scratch_operands = 0 : i64, tpu.core_type = #tpu.core_type<tc>, window_params = [{transform_indices = @transform_0, window_bounds = array<i64: 128, 256>}, {transform_indices = @transform_1, window_bounds = array<i64: 128, 256>}]} {
    %c0 = arith.constant 0 : index
    %c0_0 = arith.constant 0 : index
    %0 = vector.load %arg2[%c0, %c0_0] : memref<128x256xf32, #tpu.memory_space<vmem>>, vector<128x256xf32>
    %c0_1 = arith.constant 0 : index
    %c0_2 = arith.constant 0 : index
    %1 = vector.load %arg3[%c0_1, %c0_2] : memref<128x256xf32, #tpu.memory_space<vmem>>, vector<128x256xf32>
    tpu.vector_store %arg3[%c0_1, %c0_2], %0 {strides = array<i32>} : memref<128x256xf32, #tpu.memory_space<vmem>>, vector<128x256xf32>,
    return
  }
  func.func @transform_0(%arg0: i32, %arg1: i32) -> (i32, i32) {
    %c0_i32 = arith.constant 0 : i32
    return %arg0, %arg1 : i32, i32
  }
  func.func @transform_1(%arg0: i32, %arg1: i32) -> (i32, i32) {
    %c0_i32 = arith.constant 0 : i32
    return %arg0, %arg1 : i32, i32
  }
}

</mosaic_0001>

<bundles_post_ra>
// kernel: _passthrough_pallas.1
= control target key start
LH: loop header
LB: loop body
LE: loop exit
PB: predicated region body
PF: predicated region fallthrough
CT: control target
= control target key end

     0   :  { %6 = vsyncpa [#allocation3], 0  ;;  %s795_s0 = inlined_call_operand.hbm [shape: f32[256,512], index: 0, kind: input, shape index: {}, may-alias: {0,1}]   ;;  %s796_s1 = inlined_call_operand.hbm [shape: f32[256,512], index: 1, kind: output, shape index: {}, may-alias: {0,1}]  }
   0x1   :  { %8 = vsyncpa [#allocation3 + $0x1], 0 }
   0x2   :  { %9 = vsyncpa [#allocation4], 0 }
   0x3   :  { %11 = vsyncpa [#allocation4 + $0x1], 0  ;;  %s584_s6 = smov 0   ;;  %s586_s7 = smov 0  }
   0x4   :  { %s588_s8 = smov 0   ;;  %s590_s9 = smov 0  }
   0x5   :  { %s592_s10 = smov 0   ;;  %s594_s11 = smov 0  }
   0x6   :  { %s596_s12 = smov 0   ;;  %s598_s13 = smov 0  }
   0x7 LB: > { %s333_s14 = sadd.s32 4294967295, %s566_s13   ;;  %s334_s15 = sadd.s32 4294967294, %s566_s13   ;;  %s566_s13 = sphi %s598_s13, %s17_s13   ;;  %s562_s12 = sphi %s596_s12, %s813_s12   ;;  %s558_s11 = sphi %s594_s11, %s812_s11   ;;  %s554_s10 = sphi %s592_s10, %s811_s10   ;;  %s550_s9 = sphi %s590_s9, %s810_s9   ;;  %s546_s8 = sphi %s588_s8, %s809_s8   ;;  %s542_s7 = sphi %s586_s7, %s808_s7   ;;  %s538_s6 = sphi %s584_s6, %s807_s6  }
   0x8   : > { %s26_s16 = sadd.s32 1, %s558_s11  ;;  %s29_s17 = sadd.s32 1, %s562_s12 }
   0x9   : > { %p27_p0 = scmp.ge.s32.totalorder %s26_s16, 2  ;;  %s38_s18 = sadd.s32 1, %s546_s8 }
   0xa   : > { %p45_p1 = scmp.ne.s32.totalorder %s546_s8, %s542_s7  ;;  %p46_p2 = scmp.eq.s32.totalorder %s566_s13, 0 }
   0xb   : > { %s815_s16 = smov (%p27_p0, %s26_s16), 0  ;;  %s817_s17 = smov (!%p27_p0, %s29_s17), %s562_s12 }
   0xc   : > { %799 = sst [smem:[#allocation8_spill]] %s815_s16  ;;  %s34_s19 = ssub.s32 %s558_s11, %s815_s16 }
   0xd   : > { %p637_p3 = por %p46_p2, %p45_p1  ;;  %p31_p4 = scmp.ge.s32.totalorder %s817_s17, 2 }
   0xe   : > { %p51_p5 = scmp.ne.s32.totalorder %s542_s7, %s538_s6  ;;  %p52_p6 = scmp.eq.s32.totalorder %s333_s14, 0 }
   0xf   : > { %p77_p7 = scmp.eq.s32.totalorder %s333_s14, 3  ;;  %s819_s17 = smov (%p31_p4, %s817_s17), 0 }
  0x10   : > { %801 = sst [smem:[#allocation9_spill]] %s819_s17  ;;  %p645_p8 = por %p52_p6, %p51_p5 }
  0x11   : > { %p649_p9 = por %p77_p7, %p45_p1  ;;  %s33_s23 = ssub.s32 %s562_s12, %s819_s17 }
  0x12   : > { %p83_p10 = scmp.eq.s32.totalorder %s334_s15, 3  ;;  %s35_s24 = sor.u32 %s34_s19, %s33_s23 }
  0x13   : > { %p36_p11 = scmp.eq.s32.totalorder %s35_s24, 0  ;;  %p366_p13 = scmp.lt.s32.totalorder %s566_s13, 4 }
  0x14   : > { %p655_p12 = por %p83_p10, %p51_p5  ;;  %s103_s26 = sand.u32 1, %s546_s8  }
  0x15   : > { %s662_s27 = scalar_select %p36_p11, %s546_s8, %s38_s18  }
  0x16   : > { %s337_s28 = sshll.u32 %s103_s26, 8  ;;  %s339_s29 = sshll.u32 %s558_s11, 1 }
  0x17   : > { %s352_s30 = sshll.u32 %s562_s12, 6  ;;  %s107_s2 = scalar_lea.vmem [#allocation2], %s337_s28 }
  0x18   : > { %s118_s3 = sshll.u32 %s107_s2, 4  ;;  %s113_s4 = sadd.s32 %s352_s30, %s339_s29  ;;  %s119_s3 = int_to_ptr.vmem [resolvable:$true] %s118_s3 }
  0x19   : > { %s341_s5 = sshll.u32 %s113_s4, 3  ;;  %p359_p0 = pnand %p366_p13, %p637_p3 }
  0x1a   : > { %s115_s19 = scalar_lea.hbm %s795_s0, %s341_s5  ;;  %p342_p1 = scmp.ge.s32.totalorder %s566_s13, 1 }
  0x1b   : > { %s116_s23 = sshll.u32 %s115_s19, 4  ;;  %s104_s18 = scalar_lea.sflag [#allocation3], %s103_s26  ;;  %s117_s23 = int_to_ptr.hbm [resolvable:$true] %s116_s23 }
  0x1c   : > { %s568_s24 = smov 512   ;;  %s569_s17 = smov 256  }
  0x1d   : > { %s570_s16 = smov 16   ;;  %p126_p2 = scmp.lt.s32.totalorder %s566_s13, 5 }
  0x1e   : > { %361 = dma.hbm_to_vmem [thread:$0]  (!%p359_p0), %s117_s23, 4096, %s119_s3, %s104_s18, %s568_s24, %s569_s17, %s570_s16  }
  0x1f   : > { %p127_p4 = pnand %p342_p1, %p126_p2 }
  0x20   : > { %s674_s28 = sand.u32 (!%p127_p4), 1, %s542_s7  }
  0x21   : > { %130 = sbr.rel (%p127_p4) target bundleno = 76 (0x4c), region = 24  ;;  %s343_s20 = sshll.u32 (!%p127_p4), %s674_s28, 8 }
  0x22   : > { %s133_s29 = scalar_lea.sflag (!%p127_p4), [#allocation3], %s674_s28  ;;  %s678_s30 = scalar_lea.vmem (!%p127_p4), [#allocation2], %s343_s20 }
  0x26   : > { %529 = dma.done.wait (%p645_p8), %s133_s29, 4096  }
  0x27   : > { %531 = vsyncadd (%p645_p8), %s133_s29, 4294963200  ;;  %v160_v0 = vld [vmem:[%s678_s30] sm:$0xff]  ;;  %v161_v1 = vld [vmem:[%s678_s30 + $0x8] sm:$0xff]  ;;  %s687_s16 = scalar_lea.vmem [#allocation5], %s343_s20  ;;  %s347_s17 = sshll.u32 %s550_s9, 1 }
  0x28   : > { %v162_v2 = vld [vmem:[%s678_s30 + $0x10] sm:$0xff]  ;;  %192 = vst [vmem:[%s687_s16] sm:$0xff] %v160_v0  ;;  %v163_v3 = vld [vmem:[%s678_s30 + $0x18] sm:$0xff]  ;;  %v164_v4 = vld [vmem:[%s678_s30 + $0x20] sm:$0xff]  ;;  %s353_s21 = sshll.u32 %s554_s10, 6  ;;  %s240_s4 = sshll.u32 %s687_s16, 4  ;;  %s241_s4 = int_to_ptr.vmem [resolvable:$true] %s240_s4 }
  0x29   : > { %193 = vst [vmem:[%s687_s16 + $0x8] sm:$0xff] %v161_v1  ;;  %v165_v5 = vld [vmem:[%s678_s30 + $0x28] sm:$0xff]  ;;  %v166_v6 = vld [vmem:[%s678_s30 + $0x30] sm:$0xff]  ;;  %v167_v7 = vld [vmem:[%s678_s30 + $0x38] sm:$0xff]  ;;  %s237_s26 = sadd.s32 %s353_s21, %s347_s17  ;;  %s225_s14 = scalar_lea.sflag [#allocation4], %s674_s28 }
  0x2a   : > { %194 = vst [vmem:[%s687_s16 + $0x10] sm:$0xff] %v162_v2  ;;  %v168_v8 = vld [vmem:[%s678_s30 + $0x40] sm:$0xff]  ;;  %v169_v9 = vld [vmem:[%s678_s30 + $0x48] sm:$0xff]  ;;  %v170_v10 = vld [vmem:[%s678_s30 + $0x50] sm:$0xff]  ;;  %s349_s9 = sshll.u32 %s237_s26, 3  ;;  %s488_s24 = scalar_lea.hbm %s796_s1, 1024 }
  0x2b   : > { %195 = vst [vmem:[%s687_s16 + $0x18] sm:$0xff] %v163_v3  ;;  %v171_v11 = vld [vmem:[%s678_s30 + $0x58] sm:$0xff]  ;;  %v172_v12 = vld [vmem:[%s678_s30 + $0x60] sm:$0xff]  ;;  %v173_v13 = vld [vmem:[%s678_s30 + $0x68] sm:$0xff]  ;;  %s239_s3 = scalar_lea.hbm %s796_s1, %s349_s9 }
  0x2c   : > { %196 = vst [vmem:[%s687_s16 + $0x20] sm:$0xff] %v164_v4  ;;  %v174_v14 = vld [vmem:[%s678_s30 + $0x70] sm:$0xff]  ;;  %v175_v15 = vld [vmem:[%s678_s30 + $0x78] sm:$0xff]  ;;  %v176_v16 = vld [vmem:[%s678_s30 + $0x80] sm:$0xff]  ;;  %s242_s5 = sshll.u32 %s239_s3, 4  ;;  %s243_s5 = int_to_ptr.hbm [resolvable:$true] %s242_s5 }
  0x2d   : > { %197 = vst [vmem:[%s687_s16 + $0x28] sm:$0xff] %v165_v5  ;;  %v177_v17 = vld [vmem:[%s678_s30 + $0x88] sm:$0xff]  ;;  %v178_v18 = vld [vmem:[%s678_s30 + $0x90] sm:$0xff]  ;;  %v179_v19 = vld [vmem:[%s678_s30 + $0x98] sm:$0xff]  ;;  %s482_s15 = sshra.s32 %s243_s5, 4  ;;  %s483_s15 = int_to_ptr.hbm [resolvable:$true] %s482_s15 }
  0x2e   : > { %198 = vst [vmem:[%s687_s16 + $0x30] sm:$0xff] %v166_v6  ;;  %v180_v20 = vld [vmem:[%s678_s30 + $0xa0] sm:$0xff]  ;;  %v181_v21 = vld [vmem:[%s678_s30 + $0xa8] sm:$0xff]  ;;  %v182_v22 = vld [vmem:[%s678_s30 + $0xb0] sm:$0xff]  ;;  %s484_s19 = scalar_lea.hbm %s483_s15, 256  ;;  %p489_p7 = scmp.lt.s32.totalorder %s483_s15, %s796_s1 }
  0x2f   : > { %199 = vst [vmem:[%s687_s16 + $0x38] sm:$0xff] %v167_v7  ;;  %v183_v23 = vld [vmem:[%s678_s30 + $0xb8] sm:$0xff]  ;;  %v184_v24 = vld [vmem:[%s678_s30 + $0xc0] sm:$0xff]  ;;  %v185_v25 = vld [vmem:[%s678_s30 + $0xc8] sm:$0xff]  ;;  %p485_p3 = scmp.ne.s32.totalorder %s483_s15, %s484_s19  ;;  %p490_p8 = scmp.lt.s32.totalorder %s488_s24, %s484_s19 }
  0x30   : > { %200 = vst [vmem:[%s687_s16 + $0x40] sm:$0xff] %v168_v8  ;;  %v186_v26 = vld [vmem:[%s678_s30 + $0xd0] sm:$0xff]  ;;  %v187_v27 = vld [vmem:[%s678_s30 + $0xd8] sm:$0xff]  ;;  %v188_v28 = vld [vmem:[%s678_s30 + $0xe0] sm:$0xff] }
  0x31   : > { %201 = vst [vmem:[%s687_s16 + $0x48] sm:$0xff] %v169_v9  ;;  %v189_v29 = vld [vmem:[%s678_s30 + $0xe8] sm:$0xff]  ;;  %v190_v30 = vld [vmem:[%s678_s30 + $0xf0] sm:$0xff]  ;;  %v191_v31 = vld [vmem:[%s678_s30 + $0xf8] sm:$0xff]  ;;  %p486_p5 = pnand %p485_p3, %p649_p9  ;;  %p491_p10 = por %p490_p8, %p489_p7 }
  0x32   : > { %202 = vst [vmem:[%s687_s16 + $0x50] sm:$0xff] %v170_v10 }
  0x33   : > { %203 = vst [vmem:[%s687_s16 + $0x58] sm:$0xff] %v171_v11  ;;  %p487_p6 = pneg %p486_p5 }
  0x34   : > { %204 = vst [vmem:[%s687_s16 + $0x60] sm:$0xff] %v172_v12 }
  0x35   : > { %205 = vst [vmem:[%s687_s16 + $0x68] sm:$0xff] %v173_v13  ;;  %p492_p11 = pnand %p491_p10, %p487_p6 }
  0x36   : > { %206 = vst [vmem:[%s687_s16 + $0x70] sm:$0xff] %v174_v14 }
  0x37   : > { %207 = vst [vmem:[%s687_s16 + $0x78] sm:$0xff] %v175_v15 }
  0x38   : > { %208 = vst [vmem:[%s687_s16 + $0x80] sm:$0xff] %v176_v16 }
  0x39   : > { %209 = vst [vmem:[%s687_s16 + $0x88] sm:$0xff] %v177_v17 }
  0x3a   : > { %210 = vst [vmem:[%s687_s16 + $0x90] sm:$0xff] %v178_v18 }
  0x3b   : > { %211 = vst [vmem:[%s687_s16 + $0x98] sm:$0xff] %v179_v19 }
  0x3c   : > { %212 = vst [vmem:[%s687_s16 + $0xa0] sm:$0xff] %v180_v20 }
  0x3d   : > { %213 = vst [vmem:[%s687_s16 + $0xa8] sm:$0xff] %v181_v21 }
  0x3e   : > { %214 = vst [vmem:[%s687_s16 + $0xb0] sm:$0xff] %v182_v22 }
  0x3f   : > { %215 = vst [vmem:[%s687_s16 + $0xb8] sm:$0xff] %v183_v23 }
  0x40   : > { %216 = vst [vmem:[%s687_s16 + $0xc0] sm:$0xff] %v184_v24 }
  0x41   : > { %217 = vst [vmem:[%s687_s16 + $0xc8] sm:$0xff] %v185_v25 }
  0x42   : > { %218 = vst [vmem:[%s687_s16 + $0xd0] sm:$0xff] %v186_v26 }
  0x43   : > { %219 = vst [vmem:[%s687_s16 + $0xd8] sm:$0xff] %v187_v27 }
  0x44   : > { %220 = vst [vmem:[%s687_s16 + $0xe0] sm:$0xff] %v188_v28 }
  0x45   : > { %221 = vst [vmem:[%s687_s16 + $0xe8] sm:$0xff] %v189_v29 }
  0x46   : > { %222 = vst [vmem:[%s687_s16 + $0xf0] sm:$0xff] %v190_v30 }
  0x47   : > { %223 = vst [vmem:[%s687_s16 + $0xf8] sm:$0xff] %v191_v31 }
  0x48   : > { %495 = shalt.err (!%p492_p11)
}
  0x49   : > { %s571_s28 = smov 256   ;;  %s572_s30 = smov 512  }
  0x4a   : > { %s573_s16 = smov 16  }
  0x4b   : > { %356 = dma.vmem_to_hbm [thread:$0]  (%p649_p9), %s241_s4, 4096, %s243_s5, %s225_s14, %s571_s28, %s572_s30, %s573_s16  }
  0x4c PF: > { %p367_p13 = scmp.ge.s32.totalorder %s566_s13, 2  ;;  %s257_s17 = sand.u32 1, %s538_s6  }
  0x4d   : > { %s258_s21 = scalar_lea.sflag [#allocation4], %s257_s17 }
  0x4e   : > { %p363_p0 = pnand %p367_p13, %p655_p12 }
  0x50   : > { %p364_p1 = pneg %p363_p0 }
  0x52   : > { %533 = dma.done.wait (%p364_p1), %s258_s21, 4096  }
  0x53   : > { %535 = vsyncadd (%p364_p1), %s258_s21, 4294963200  ;;  %s17_s13 = sadd.s32 1, %s566_s13   ;;  %s805_s22 = sld [smem:[#allocation8_spill]] }
  0x54   : > { %p14_p2 = scmp.ge.s32.totalorder %s17_s13, 6   ;;  %s806_s26 = sld [smem:[#allocation9_spill]] }
  0x55   : > { %s807_s6 = smov %s542_s7  ;;  %s808_s7 = smov %s546_s8 }
  0x56   : > { %s809_s8 = smov %s662_s27  ;;  %s810_s9 = smov %s558_s11 }
  0x57   : > { %s811_s10 = smov %s562_s12  ;;  %16 = sbr.rel (!%p14_p2) target bundleno = 7 (0x7), region = 69 }
  0x59   : > { %s812_s11 = smov %s805_s22 }
  0x5a   : > { %s813_s12 = smov %s806_s26 }
  0x5c   :  { %264 = vsyncpa [#allocation3], 1 }
  0x5d   :  { %266 = vsyncpa [#allocation3 + $0x1], 1 }
  0x5e   :  { %267 = vsyncpa [#allocation4], 1 }
  0x5f   :  { %269 = vsyncpa [#allocation4 + $0x1], 1 }

</bundles_post_ra>
